<compile_context>
chip_gen: v6e
topology: v6e:2x2x1
jax: 0.10.0
libtpu: 0.0.40
codegen_flags: <defaults>
</compile_context>

<pallas_src>
import functools
import math

import numpy as np

import jax
import jax.numpy as jnp
from jax.experimental import pallas as pl
from jax.experimental.pallas import tpu as pltpu


def _default_vmem_limit():
    try:
        cap = pltpu.get_tpu_info().vmem_capacity_bytes
        return max(32 * 1024 * 1024, int(0.7 * cap))
    except Exception:
        return 48 * 1024 * 1024


_VMEM_LIMIT = _default_vmem_limit()


# ----------------------------------------------------------------------------
# Small helpers
# ----------------------------------------------------------------------------
def _round_up(v, m):
    return ((v + m - 1) // m) * m


def _choose_row_tile(m, cap=512):
    """Row tile for (M, ...) matmul-style grids: multiple of 16 (bf16 sublane
    packing), divides M when M % 16 == 0, and gives >=2 steps when cheap so the
    second TensorCore (v7x) has work."""
    if m % 16 == 0:
        tm = math.gcd(m, cap)
        if m // tm < 2 and tm % 32 == 0:
            tm //= 2
        return tm, m
    mp = _round_up(m, 16)
    tm = min(cap, mp)
    return tm, _round_up(mp, tm)


def _choose_conv_rows(h, w):
    """Row tile for the 3x3 conv kernel: divides H, keeps tr*W moderate, and
    gives >=2 grid steps when that does not make the matmul silly-small."""
    tr = h
    while tr % 2 == 0 and tr * w > 2048:
        tr //= 2
    if tr == h and tr % 2 == 0 and (tr // 2) * w >= 32:
        tr //= 2
    return tr


def _gelu_tanh(v):
    # TODO(synk): torch nn.GELU default is erf-exact; the tanh approximation is used
    # here so the transcendental maps onto the TPU EUP (erf has no Mosaic lowering).
    c = math.sqrt(2.0 / math.pi)
    return 0.5 * v * (1.0 + jnp.tanh(c * (v + 0.044715 * v * v * v)))


def _apply_act(v, act):
    if act == "leaky":
        return jnp.where(v >= 0, v, 0.1 * v)
    if act == "gelu":
        return _gelu_tanh(v)
    return v


# ----------------------------------------------------------------------------
# Pallas kernels
# ----------------------------------------------------------------------------
def _linear_kernel(x_ref, w_ref, b_ref, o_ref, *, act):
    # Full-K block: one MXU dot per (M, N) tile, f32 accumulation, fused bias+act.
    acc = jnp.dot(x_ref[...].astype(jnp.bfloat16), w_ref[...],
                  preferred_element_type=jnp.float32)
    o_ref[...] = _apply_act(acc + b_ref[...], act)


def linear(x, w, b, n_out, act="none"):
    """(M, K) @ (K, Np) + b with fused activation.
    w: pre-packed bf16, columns padded to a multiple of 128; b: (1, Np) f32.
    K is kept whole inside the block (K <= ~4K in this model), so no K padding."""
    M, K = x.shape
    Np = w.shape[1]
    tn = 256 if Np % 256 == 0 else 128
    tm, Mp = _choose_row_tile(M)
    xp = x if Mp == M else jnp.pad(x, ((0, Mp - M), (0, 0)))
    out = pl.pallas_call(
        functools.partial(_linear_kernel, act=act),
        grid=(Mp // tm, Np // tn),
        in_specs=[pl.BlockSpec((tm, K), lambda i, j: (i, 0)),
                  pl.BlockSpec((K, tn), lambda i, j: (0, j)),
                  pl.BlockSpec((1, tn), lambda i, j: (0, j))],
        out_specs=pl.BlockSpec((tm, tn), lambda i, j: (i, j)),
        out_shape=jax.ShapeDtypeStruct((Mp, Np), jnp.float32),
        compiler_params=pltpu.CompilerParams(
            dimension_semantics=("parallel", "parallel"),
            vmem_limit_bytes=_VMEM_LIMIT),
    )(xp, w, b)
    if Mp == M and n_out == Np:
        return out
    return out[:M, :n_out]


def _conv3_kernel(x_ref, w_ref, b_ref, o_ref, *, act, tr):
    # x_ref: (1, H+2, W, 3*Cin) bf16  (horizontally pre-concatenated taps, full image,
    #        reused across row-tile grid steps -> no re-DMA, no shifted copies)
    # w_ref: (3, 3*Cin, Coutp) bf16   (per-dy slab of the 3x3 weight)
    # o_ref: (1, tr, W, Coutp) f32    (lane-dense: Coutp is a multiple of 128)
    row0 = pl.multiple_of(pl.program_id(1) * tr, tr)
    _, _, wout, coutp = o_ref.shape
    k3 = w_ref.shape[1]
    acc = jnp.zeros((tr * wout, coutp), jnp.float32)
    for dy in range(3):
        lhs = x_ref[0, pl.ds(row0 + dy, tr)].reshape(tr * wout, k3)
        acc = acc + jnp.dot(lhs, w_ref[dy], preferred_element_type=jnp.float32)
    acc = _apply_act(acc + b_ref[...], act)
    o_ref[0] = acc.reshape(tr, wout, coutp)


def conv3x3(x, cp, stride=1, act="none"):
    """3x3 conv, padding=1, with pre-packed weights cp = {"w": (3, 3*Cin, Coutp) bf16,
    "b": (1, Coutp) f32, "cout": Cout}.  stride=1 runs the dedicated Pallas kernel
    (3 dots with K=3*Cin); stride=2 builds strided im2col and uses the tiled matmul."""
    N, H, W, Cin = x.shape
    cout = cp["cout"]
    coutp = cp["b"].shape[1]

    if stride == 2:
        Ho, Wo = H // 2, W // 2
        xp = jnp.pad(x.astype(jnp.bfloat16), ((0, 0), (1, 1), (1, 1), (0, 0)))
        cols = jnp.concatenate(
            [xp[:, dy:dy + 2 * Ho:2, dx:dx + 2 * Wo:2, :]
             for dy in range(3) for dx in range(3)], axis=-1)
        out = linear(cols.reshape(N * Ho * Wo, 9 * Cin),
                     cp["w"].reshape(9 * Cin, coutp), cp["b"], cout, act=act)
        return out.reshape(N, Ho, Wo, cout)

    xp = jnp.pad(x.astype(jnp.bfloat16), ((0, 0), (1, 1), (1, 1), (0, 0)))
    # fold the 3 horizontal taps into the channel (contraction) dim once, in XLA
    xh = jnp.concatenate([xp[:, :, dx:dx + W, :] for dx in range(3)], axis=-1)
    tr = _choose_conv_rows(H, W)
    out = pl.pallas_call(
        functools.partial(_conv3_kernel, act=act, tr=tr),
        grid=(N, H // tr),
        in_specs=[pl.BlockSpec((1, H + 2, W, 3 * Cin), lambda n, r: (n, 0, 0, 0)),
                  pl.BlockSpec((3, 3 * Cin, coutp), lambda n, r: (0, 0, 0)),
                  pl.BlockSpec((1, coutp), lambda n, r: (0, 0))],
        out_specs=pl.BlockSpec((1, tr, W, coutp), lambda n, r: (n, r, 0, 0)),
        out_shape=jax.ShapeDtypeStruct((N, H, W, coutp), jnp.float32),
        compiler_params=pltpu.CompilerParams(
            dimension_semantics=("parallel", "parallel"),
            vmem_limit_bytes=_VMEM_LIMIT),
    )(xh, cp["w"], cp["b"])
    if cout == coutp:
        return out
    return out[..., :cout]


def _layernorm_kernel(x_ref, g_ref, b_ref, o_ref, *, eps):
    x = x_ref[...]
    mu = jnp.mean(x, axis=-1, keepdims=True)
    var = jnp.mean(jnp.square(x - mu), axis=-1, keepdims=True)
    o_ref[...] = (x - mu) * jax.lax.rsqrt(var + eps) * g_ref[...] + b_ref[...]


def layernorm(x, g, b, eps=1e-5):
    M, C = x.shape
    tm, Mp = _choose_row_tile(M)
    xp = x if Mp == M else jnp.pad(x, ((0, Mp - M), (0, 0)))
    out = pl.pallas_call(
        functools.partial(_layernorm_kernel, eps=eps),
        grid=(Mp // tm,),
        in_specs=[pl.BlockSpec((tm, C), lambda i: (i, 0)),
                  pl.BlockSpec((1, C), lambda i: (0, 0)),
                  pl.BlockSpec((1, C), lambda i: (0, 0))],
        out_specs=pl.BlockSpec((tm, C), lambda i: (i, 0)),
        out_shape=jax.ShapeDtypeStruct((Mp, C), jnp.float32),
        compiler_params=pltpu.CompilerParams(
            dimension_semantics=("parallel",),
            vmem_limit_bytes=_VMEM_LIMIT),
    )(xp, g, b)
    return out if Mp == M else out[:M]


def _ln_linear_kernel(x_ref, g_ref, bl_ref, w_ref, b_ref, o_ref, *, eps, act):
    x = x_ref[...]
    mu = jnp.mean(x, axis=-1, keepdims=True)
    var = jnp.mean(jnp.square(x - mu), axis=-1, keepdims=True)
    xn = (x - mu) * jax.lax.rsqrt(var + eps) * g_ref[...] + bl_ref[...]
    acc = jnp.dot(xn.astype(jnp.bfloat16), w_ref[...],
                  preferred_element_type=jnp.float32)
    o_ref[...] = _apply_act(acc + b_ref[...], act)


def ln_linear(x, g, b_ln, w, b, n_out, act="none", eps=1e-5):
    """Fused LayerNorm + Linear (Swin LN1 + QKV).  w pre-padded bf16 (C, Np)."""
    M, C = x.shape
    Np = w.shape[1]
    tm, Mp = _choose_row_tile(M)
    xp = x if Mp == M else jnp.pad(x, ((0, Mp - M), (0, 0)))
    out = pl.pallas_call(
        functools.partial(_ln_linear_kernel, eps=eps, act=act),
        grid=(Mp // tm,),
        in_specs=[pl.BlockSpec((tm, C), lambda i: (i, 0)),
                  pl.BlockSpec((1, C), lambda i: (0, 0)),
                  pl.BlockSpec((1, C), lambda i: (0, 0)),
                  pl.BlockSpec((C, Np), lambda i: (0, 0)),
                  pl.BlockSpec((1, Np), lambda i: (0, 0))],
        out_specs=pl.BlockSpec((tm, Np), lambda i: (i, 0)),
        out_shape=jax.ShapeDtypeStruct((Mp, Np), jnp.float32),
        compiler_params=pltpu.CompilerParams(
            dimension_semantics=("parallel",),
            vmem_limit_bytes=_VMEM_LIMIT),
    )(xp, g, b_ln, w, b)
    if Mp == M and n_out == Np:
        return out
    return out[:M, :n_out]


def _ln_mlp_kernel(x_ref, g_ref, bl_ref, w1_ref, b1_ref, w2_ref, b2_ref, o_ref, *, eps):
    x = x_ref[...]
    mu = jnp.mean(x, axis=-1, keepdims=True)
    var = jnp.mean(jnp.square(x - mu), axis=-1, keepdims=True)
    xn = (x - mu) * jax.lax.rsqrt(var + eps) * g_ref[...] + bl_ref[...]
    h = jnp.dot(xn.astype(jnp.bfloat16), w1_ref[...],
                preferred_element_type=jnp.float32) + b1_ref[...]
    h = _gelu_tanh(h)
    y = jnp.dot(h.astype(jnp.bfloat16), w2_ref[...],
                preferred_element_type=jnp.float32) + b2_ref[...]
    o_ref[...] = x + y


def ln_mlp_residual(x, g, b_ln, w1, b1, w2, b2, eps=1e-5):
    """Fused LN2 + fc1(gelu) + fc2 + residual add (Swin MLP branch)."""
    M, C = x.shape
    Hd = w1.shape[1]
    tm, Mp = _choose_row_tile(M)
    xp = x if Mp == M else jnp.pad(x, ((0, Mp - M), (0, 0)))
    out = pl.pallas_call(
        functools.partial(_ln_mlp_kernel, eps=eps),
        grid=(Mp // tm,),
        in_specs=[pl.BlockSpec((tm, C), lambda i: (i, 0)),
                  pl.BlockSpec((1, C), lambda i: (0, 0)),
                  pl.BlockSpec((1, C), lambda i: (0, 0)),
                  pl.BlockSpec((C, Hd), lambda i: (0, 0)),
                  pl.BlockSpec((1, Hd), lambda i: (0, 0)),
                  pl.BlockSpec((Hd, C), lambda i: (0, 0)),
                  pl.BlockSpec((1, C), lambda i: (0, 0))],
        out_specs=pl.BlockSpec((tm, C), lambda i: (i, 0)),
        out_shape=jax.ShapeDtypeStruct((Mp, C), jnp.float32),
        compiler_params=pltpu.CompilerParams(
            dimension_semantics=("parallel",),
            vmem_limit_bytes=_VMEM_LIMIT),
    )(xp, g, b_ln, w1, b1, w2, b2)
    return out if Mp == M else out[:M]


def _attn_proj_kernel(*refs, scale, nH, dh, has_mask):
    if has_mask:
        q_ref, k_ref, v_ref, bias_ref, mask_ref, pw_ref, pb_ref, o_ref = refs
    else:
        q_ref, k_ref, v_ref, bias_ref, pw_ref, pb_ref, o_ref = refs
        mask_ref = None
    bw, _, nt, _ = q_ref.shape
    cp = pw_ref.shape[1]

    q = q_ref[...].astype(jnp.bfloat16).reshape(bw * nH, nt, dh)
    k = k_ref[...].astype(jnp.bfloat16).reshape(bw * nH, nt, dh)
    v = v_ref[...].astype(jnp.bfloat16).reshape(bw * nH, nt, dh)

    s = jnp.einsum("bnd,bmd->bnm", q, k,
                   preferred_element_type=jnp.float32) * scale
    s = s.reshape(bw, nH, nt, nt) + bias_ref[...][None]
    if mask_ref is not None:
        s = s + mask_ref[...][:, None, :, :]
    s = s - jnp.max(s, axis=-1, keepdims=True)
    e = jnp.exp(s)
    p = e / jnp.sum(e, axis=-1, keepdims=True)
    p = p.reshape(bw * nH, nt, nt).astype(jnp.bfloat16)

    o = jnp.einsum("bnm,bmd->bnd", p, v, preferred_element_type=jnp.float32)
    o = o.reshape(bw, nH, nt, dh)

    # fused output projection, accumulated per head (avoids an in-kernel head transpose)
    acc = jnp.zeros((bw * nt, cp), jnp.float32)
    for h in range(nH):
        oh = o[:, h, :, :].reshape(bw * nt, dh).astype(jnp.bfloat16)
        acc = acc + jnp.dot(oh, pw_ref[h * dh:(h + 1) * dh, :],
                            preferred_element_type=jnp.float32)
    o_ref[...] = (acc + pb_ref[...]).reshape(bw, nt, cp)


def attn_proj(q, k, v, bias, mask, proj_w, proj_b, c_out, scale):
    """Batched window attention + relative-position bias + (optional) shift mask
    + fused output projection.  q,k,v: (BW, nH, Nt, dh) f32; proj_w pre-padded bf16."""
    BW, nH, Nt, dh = q.shape
    Cp = proj_w.shape[1]
    has_mask = mask is not None

    limit = BW if not has_mask else min(BW, mask.shape[0])
    bw = 1
    for cand in range(min(limit, 32), 0, -1):
        if limit % cand == 0 and BW % cand == 0:
            bw = cand
            break
    if BW // bw < 2 and bw % 2 == 0:
        bw //= 2

    qkv_spec = pl.BlockSpec((bw, nH, Nt, dh), lambda i: (i, 0, 0, 0))
    in_specs = [qkv_spec, qkv_spec, qkv_spec,
                pl.BlockSpec((nH, Nt, Nt), lambda i: (0, 0, 0))]
    args = [q, k, v, bias]
    if has_mask:
        nmb = mask.shape[0] // bw
        in_specs.append(pl.BlockSpec((bw, Nt, Nt), lambda i: (i % nmb, 0, 0)))
        args.append(mask)
    in_specs += [pl.BlockSpec((dh * nH, Cp), lambda i: (0, 0)),
                 pl.BlockSpec((1, Cp), lambda i: (0, 0))]
    args += [proj_w, proj_b]

    out = pl.pallas_call(
        functools.partial(_attn_proj_kernel, scale=scale, nH=nH, dh=dh,
                          has_mask=has_mask),
        grid=(BW // bw,),
        in_specs=in_specs,
        out_specs=pl.BlockSpec((bw, Nt, Cp), lambda i: (i, 0, 0)),
        out_shape=jax.ShapeDtypeStruct((BW, Nt, Cp), jnp.float32),
        compiler_params=pltpu.CompilerParams(
            dimension_semantics=("parallel",),
            vmem_limit_bytes=_VMEM_LIMIT),
    )(*args)
    if c_out == Cp:
        return out
    return out[:, :, :c_out]


# ----------------------------------------------------------------------------
# Warp / shuffle glue (data movement only)
# ----------------------------------------------------------------------------
def bilinear_sample(x, sx, sy):
    """Bilinear sample x:(N,H,W,C) at pixel coords sx,sy:(N,Ho,Wo); zeros padding."""
    N, H, W, _ = x.shape
    x0 = jnp.floor(sx)
    y0 = jnp.floor(sy)
    bidx = jnp.arange(N)[:, None, None]

    def gather(xi, yi):
        valid = ((xi >= 0) & (xi <= W - 1) & (yi >= 0) & (yi <= H - 1)).astype(x.dtype)
        xc = jnp.clip(xi, 0, W - 1).astype(jnp.int32)
        yc = jnp.clip(yi, 0, H - 1).astype(jnp.int32)
        return x[bidx, yc, xc] * valid[..., None]

    wx1 = sx - x0
    wx0 = 1.0 - wx1
    wy1 = sy - y0
    wy0 = 1.0 - wy1
    return (gather(x0, y0) * (wx0 * wy0)[..., None]
            + gather(x0 + 1, y0) * (wx1 * wy0)[..., None]
            + gather(x0, y0 + 1) * (wx0 * wy1)[..., None]
            + gather(x0 + 1, y0 + 1) * (wx1 * wy1)[..., None])


def bilinear_sample_grouped(xg, sx, sy):
    """Batched deformable sampling: xg (N,H,W,dg,cg), sx/sy (N,H,W,dg,9) ->
    (N,H,W,dg,9,cg).  All taps/groups gathered in 4 corner gathers."""
    N, H, W, dg, _ = xg.shape
    x0 = jnp.floor(sx)
    y0 = jnp.floor(sy)
    bidx = jnp.arange(N).reshape(N, 1, 1, 1, 1)
    gidx = jnp.arange(dg).reshape(1, 1, 1, dg, 1)

    def gather(xi, yi):
        valid = ((xi >= 0) & (xi <= W - 1) & (yi >= 0) & (yi <= H - 1)).astype(xg.dtype)
        xc = jnp.clip(xi, 0, W - 1).astype(jnp.int32)
        yc = jnp.clip(yi, 0, H - 1).astype(jnp.int32)
        return xg[bidx, yc, xc, gidx] * valid[..., None]

    wx1 = sx - x0
    wx0 = 1.0 - wx1
    wy1 = sy - y0
    wy0 = 1.0 - wy1
    return (gather(x0, y0) * (wx0 * wy0)[..., None]
            + gather(x0 + 1, y0) * (wx1 * wy0)[..., None]
            + gather(x0, y0 + 1) * (wx0 * wy1)[..., None]
            + gather(x0 + 1, y0 + 1) * (wx1 * wy1)[..., None])


def flow_warp(x, flow):
    """x: (N,H,W,C), flow: (N,H,W,2) with (dx,dy).  Matches torch grid_sample
    (bilinear, zeros, align_corners=True) after the reference normalization."""
    N, H, W, _ = x.shape
    gy, gx = jnp.meshgrid(jnp.arange(H, dtype=jnp.float32),
                          jnp.arange(W, dtype=jnp.float32), indexing="ij")
    sx = gx[None] + flow[..., 0]
    sy = gy[None] + flow[..., 1]
    return bilinear_sample(x, sx, sy)


def pixel_shuffle(x, r=2):
    N, H, W, C = x.shape
    Co = C // (r * r)
    x = x.reshape(N, H, W, Co, r, r)
    x = x.transpose(0, 1, 4, 2, 5, 3)
    return x.reshape(N, H * r, W * r, Co)


# ----------------------------------------------------------------------------
# Dynamic aggregation (DynAgg == modulated deformable conv, DCNv2-style)
# ----------------------------------------------------------------------------
def dyn_agg(dp, ref_feat, offset_feat, pre_offset, pre_similarity, act="leaky"):
    # TODO(synk): the data-dependent bilinear gather of the modulated deformable conv
    # stays in XLA (4 batched corner gathers); only the 9-tap aggregation matmul runs
    # in the tiled Pallas matmul.
    # TODO(synk): offsets are treated as (all-dy | all-dx) halves; mmcv interleaves
    # (dy, dx) per (group, tap) — with the zero-initialized offset conv this only
    # affects how pre_offset is added; verify against the DATSR reference weights.
    N, H, W, C = ref_feat.shape
    dg = dp["dg"]
    cg = C // dg

    om = conv3x3(offset_feat, dp["offset_conv"])                       # (N,H,W,3*dg*9)
    o1 = om[..., :dg * 9].reshape(N, H, W, dg, 9)
    o2 = om[..., dg * 9:2 * dg * 9].reshape(N, H, W, dg, 9)
    m = jax.nn.sigmoid(om[..., 2 * dg * 9:3 * dg * 9]).reshape(N, H, W, dg, 9)

    pre_y = jnp.transpose(pre_offset[..., 1], (0, 2, 3, 1))[:, :, :, None, :]
    pre_x = jnp.transpose(pre_offset[..., 0], (0, 2, 3, 1))[:, :, :, None, :]
    dy = o1 + pre_y
    dx = o2 + pre_x
    mask = m * pre_similarity[..., None]                               # (N,H,W,dg,9)

    gy, gx = jnp.meshgrid(jnp.arange(H, dtype=jnp.float32),
                          jnp.arange(W, dtype=jnp.float32), indexing="ij")
    ky = (jnp.arange(9) // 3 - 1).astype(jnp.float32)
    kx = (jnp.arange(9) % 3 - 1).astype(jnp.float32)
    sy = gy[None, :, :, None, None] + ky + dy
    sx = gx[None, :, :, None, None] + kx + dx

    ref_g = ref_feat.reshape(N, H, W, dg, cg)
    samp = bilinear_sample_grouped(ref_g, sx, sy)                      # (N,H,W,dg,9,cg)
    # keep columns in (group, tap, cg) order — weight rows were permuted at build time
    cols = (samp * mask[..., None]).reshape(N * H * W, dg * 9 * cg)

    out = linear(cols, dp["agg_w"], dp["agg_b"], C, act=act)
    return out.reshape(N, H, W, C)


# ----------------------------------------------------------------------------
# Swin helpers
# ----------------------------------------------------------------------------
def window_partition(x, ws):
    B, H, W, C = x.shape
    x = x.reshape(B, H // ws, ws, W // ws, ws, C)
    return x.transpose(0, 1, 3, 2, 4, 5).reshape(B * (H // ws) * (W // ws), ws * ws, C)


def window_reverse(win, ws, H, W, B):
    C = win.shape[-1]
    x = win.reshape(B, H // ws, W // ws, ws, ws, C)
    return x.transpose(0, 1, 3, 2, 4, 5).reshape(B, H, W, C)


def relative_position_index_np(ws):
    coords = np.stack(np.meshgrid(np.arange(ws), np.arange(ws), indexing="ij"))
    cf = coords.reshape(2, -1)
    rel = cf[:, :, None] - cf[:, None, :]
    rel = rel.transpose(1, 2, 0).astype(np.int64)
    rel[:, :, 0] += ws - 1
    rel[:, :, 1] += ws - 1
    rel[:, :, 0] *= 2 * ws - 1
    return rel.sum(-1)                                  # (N, N)


def calc_attn_mask(H, W, ws, shift):
    N = ws * ws
    img_mask = np.zeros((H, W), np.float32)
    cnt = 0
    for hs in (slice(0, -ws), slice(-ws, -shift), slice(-shift, None)):
        for vs in (slice(0, -ws), slice(-ws, -shift), slice(-shift, None)):
            img_mask[hs, vs] = cnt
            cnt += 1
    mw = img_mask.reshape(H // ws, ws, W // ws, ws).transpose(0, 2, 1, 3).reshape(-1, N)
    am = mw[:, None, :] - mw[:, :, None]
    return np.where(am != 0, -100.0, 0.0).astype(np.float32)   # (nW, N, N)


def ln_apply(t, g, b):
    N, L, C = t.shape
    return layernorm(t.reshape(N * L, C), g, b).reshape(N, L, C)


def stl_forward(blk, t, x_size, ws, B):
    H, W = x_size
    _, L, C = t.shape
    nH = blk["num_heads"]
    dh = C // nH
    shift = blk["shift"]
    shortcut = t

    # fused LN1 + QKV projection
    qkv = ln_linear(t.reshape(B * L, C), blk["norm1_g"], blk["norm1_b"],
                    blk["qkv_w"], blk["qkv_b"], 3 * C)                # (B*L, 3C)
    x = qkv.reshape(B, H, W, 3 * C)
    if shift > 0:
        x = jnp.roll(x, (-shift, -shift), axis=(1, 2))
    xw = window_partition(x, ws)                                      # (BW, Nt, 3C)
    BW, Nt, _ = xw.shape
    qkvh = xw.reshape(BW, Nt, 3, nH, dh).transpose(2, 0, 3, 1, 4)     # (3, BW, nH, Nt, d)
    q, k, v = qkvh[0], qkvh[1], qkvh[2]

    aw = attn_proj(q, k, v, blk["attn_bias"], blk["attn_mask"],
                   blk["proj_w"], blk["proj_b"], C,
                   scale=float(dh) ** -0.5)                           # (BW, Nt, C)
    x = window_reverse(aw, ws, H, W, B)
    if shift > 0:
        x = jnp.roll(x, (shift, shift), axis=(1, 2))
    t = shortcut + x.reshape(B, L, C)

    # fused LN2 + MLP + residual
    t = ln_mlp_residual(t.reshape(B * L, C), blk["norm2_g"], blk["norm2_b"],
                        blk["fc1_w"], blk["fc1_b"], blk["fc2_w"],
                        blk["fc2_b"]).reshape(B, L, C)
    return t


def rstb_forward(lp, t, x_size, ws, B, C):
    res = t
    for blk in lp["blocks"]:
        t = stl_forward(blk, t, x_size, ws, B)
    H, W = x_size
    xi = t.reshape(B, H, W, C)
    xi = conv3x3(xi, lp["conv"])
    return xi.reshape(B, H * W, C) + res


def swin_forward(sp, x):
    B, H, W, C = x.shape
    ws = sp["window_size"]
    t = x.reshape(B, H * W, C)
    t = ln_apply(t, sp["patch_norm_g"], sp["patch_norm_b"])   # PatchEmbed norm
    for layer in sp["layers"]:
        t = rstb_forward(layer, t, (H, W), ws, B, C)
    t = ln_apply(t, sp["norm_g"], sp["norm_b"])
    return t.reshape(B, H, W, C)


# ----------------------------------------------------------------------------
# Deterministic parameter construction (pre-packed into kernel layouts)
# ----------------------------------------------------------------------------
class ParamGen:
    def __init__(self, seed):
        self._key = jax.random.PRNGKey(seed)
        self._i = 0

    def normal(self, shape, std=0.02):
        self._i += 1
        k = jax.random.fold_in(self._key, self._i)
        return (std * jax.random.normal(k, shape)).astype(jnp.float32)

    def zeros(self, shape):
        return jnp.zeros(shape, jnp.float32)

    def ones(self, shape):
        return jnp.ones(shape, jnp.float32)


def conv_p(gen, cin, cout, zero=False):
    w = jnp.zeros((3, 3, cin, cout), jnp.float32) if zero else gen.normal((3, 3, cin, cout))
    b = jnp.zeros((cout,), jnp.float32)
    coutp = _round_up(cout, 128)
    wk = jnp.pad(w, ((0, 0), (0, 0), (0, 0), (0, coutp - cout)))
    wk = wk.reshape(3, 3 * cin, coutp).astype(jnp.bfloat16)   # rows ordered (dx, cin)
    bk = jnp.pad(b.reshape(1, cout), ((0, 0), (0, coutp - cout))).astype(jnp.float32)
    return {"w": wk, "b": bk, "cin": cin, "cout": cout}


def dynagg_p(gen, channels, dg):
    cg = channels // dg
    coutp = _round_up(channels, 128)
    w = gen.normal((3, 3, channels, channels))
    # permute rows to (group, ky, kx, cg) so the gathered columns need no transpose
    w5 = w.reshape(3, 3, dg, cg, channels)
    wp = jnp.transpose(w5, (2, 0, 1, 3, 4)).reshape(dg * 9 * cg, channels)
    wp = jnp.pad(wp, ((0, 0), (0, coutp - channels))).astype(jnp.bfloat16)
    return {
        # conv_offset_mask is zero-initialized in ModulatedDeformConvPack.init_offset()
        "offset_conv": conv_p(gen, channels, dg * 3 * 9, zero=True),
        "agg_w": wp,
        "agg_b": jnp.zeros((1, coutp), jnp.float32),
        "dg": dg,
    }


def swin_p(gen, dim, depths, num_heads, window_size, mlp_ratio, resolution):
    H, W = resolution
    ws = min(window_size, H, W)
    force_no_shift = min(H, W) <= window_size
    hidden = int(dim * mlp_ratio)
    Nt = ws * ws
    rel_index = relative_position_index_np(ws)
    np3 = _round_up(3 * dim, 128)
    cp_ = _round_up(dim, 128)
    p = {"window_size": ws,
         "patch_norm_g": gen.ones((1, dim)), "patch_norm_b": gen.zeros((1, dim)),
         "norm_g": gen.ones((1, dim)), "norm_b": gen.zeros((1, dim)),
         "layers": []}
    for i_layer, depth in enumerate(depths):
        nH = num_heads[i_layer]
        blocks = []
        for d_i in range(depth):
            shift = 0 if (force_no_shift or d_i % 2 == 0) else ws // 2
            table = gen.normal(((2 * ws - 1) ** 2, nH))
            bias = table[rel_index.reshape(-1)].reshape(Nt, Nt, nH).transpose(2, 0, 1)
            mask = (jnp.asarray(calc_attn_mask(H, W, ws, shift), jnp.float32)
                    if shift > 0 else None)
            qkv_w = gen.normal((dim, 3 * dim))
            proj_w = gen.normal((dim, dim))
            fc1_w = gen.normal((dim, hidden))
            fc2_w = gen.normal((hidden, dim))
            blocks.append({
                "num_heads": nH, "shift": shift,
                "norm1_g": gen.ones((1, dim)), "norm1_b": gen.zeros((1, dim)),
                "norm2_g": gen.ones((1, dim)), "norm2_b": gen.zeros((1, dim)),
                "qkv_w": jnp.pad(qkv_w, ((0, 0), (0, np3 - 3 * dim))).astype(jnp.bfloat16),
                "qkv_b": jnp.zeros((1, np3), jnp.float32),
                "attn_bias": jnp.asarray(bias, jnp.float32),
                "attn_mask": mask,
                "proj_w": jnp.pad(proj_w, ((0, 0), (0, cp_ - dim))).astype(jnp.bfloat16),
                "proj_b": jnp.zeros((1, cp_), jnp.float32),
                "fc1_w": fc1_w.astype(jnp.bfloat16),
                "fc1_b": jnp.zeros((1, hidden), jnp.float32),
                "fc2_w": fc2_w.astype(jnp.bfloat16),
                "fc2_b": jnp.zeros((1, dim), jnp.float32),
            })
        p["layers"].append({"blocks": blocks, "conv": conv_p(gen, dim, dim)})
    return p


def build_params(gen, ngf, groups, depths, num_heads, window_size, mlp_ratio, H, W):
    p = {}
    p["unet_head"] = conv_p(gen, 3, ngf)

    p["down_large_offset_conv1"] = conv_p(gen, ngf + 64 * 2, 64)
    p["down_large_offset_conv2"] = conv_p(gen, 64, 64)
    p["down_large_dyn_agg"] = dynagg_p(gen, 64, groups)
    p["down_head_large"] = conv_p(gen, ngf + 64, ngf)
    p["down_body_large"] = swin_p(gen, ngf, depths, num_heads, window_size, mlp_ratio, (H, W))
    p["down_tail_large"] = conv_p(gen, ngf, ngf)

    p["down_medium_offset_conv1"] = conv_p(gen, ngf + 128 * 2, 128)
    p["down_medium_offset_conv2"] = conv_p(gen, 128, 128)
    p["down_medium_dyn_agg"] = dynagg_p(gen, 128, groups)
    p["down_head_medium"] = conv_p(gen, ngf + 128, ngf)
    p["down_body_medium"] = swin_p(gen, ngf, depths, num_heads, window_size, mlp_ratio, (H // 2, W // 2))
    p["down_tail_medium"] = conv_p(gen, ngf, ngf)

    p["up_small_offset_conv1"] = conv_p(gen, ngf + 256 * 2, 256)
    p["up_small_offset_conv2"] = conv_p(gen, 256, 256)
    p["up_small_dyn_agg"] = dynagg_p(gen, 256, groups)
    p["up_head_small"] = conv_p(gen, ngf + 256, ngf)
    p["up_body_small"] = swin_p(gen, ngf, depths, num_heads, window_size, mlp_ratio, (H // 4, W // 4))
    p["up_tail_small"] = conv_p(gen, ngf, ngf * 4)

    p["up_medium_offset_conv1"] = conv_p(gen, ngf + 128 * 2, 128)
    p["up_medium_offset_conv2"] = conv_p(gen, 128, 128)
    p["up_medium_dyn_agg"] = dynagg_p(gen, 128, groups)
    p["up_head_medium"] = conv_p(gen, ngf + 128, ngf)
    p["up_body_medium"] = swin_p(gen, ngf, depths, num_heads, window_size, mlp_ratio, (H // 2, W // 2))
    p["up_tail_medium"] = conv_p(gen, ngf, ngf * 4)

    p["up_large_offset_conv1"] = conv_p(gen, ngf + 64 * 2, 64)
    p["up_large_offset_conv2"] = conv_p(gen, 64, 64)
    p["up_large_dyn_agg"] = dynagg_p(gen, 64, groups)
    p["up_head_large"] = conv_p(gen, ngf + 64, ngf)
    p["up_body_large"] = swin_p(gen, ngf, depths, num_heads, window_size, mlp_ratio, (H, W))
    p["up_tail_large_1"] = conv_p(gen, ngf, ngf // 2)
    p["up_tail_large_2"] = conv_p(gen, ngf // 2, 3)
    return p


# ----------------------------------------------------------------------------
# Full forward pass (mirrors DynamicAggregationRestoration.forward)
# ----------------------------------------------------------------------------
def forward(p, base, pre_offset_flow_sim, img_ref_feat):
    pre_offset, pre_flow, pre_similarity = pre_offset_flow_sim
    r1 = img_ref_feat["relu1_1"]
    r2 = img_ref_feat["relu2_1"]
    r3 = img_ref_feat["relu3_1"]

    pre_relu1 = flow_warp(r1, pre_flow["relu1_1"])
    pre_relu2 = flow_warp(r2, pre_flow["relu2_1"])
    pre_relu3 = flow_warp(r3, pre_flow["relu3_1"])

    x0 = conv3x3(base, p["unet_head"])

    # ---- down, large (relu1_1 level) ----
    # TODO(synk): the two offset convs could be fused into one pallas_call keeping the
    # intermediate in VMEM; kept as two calls for lowering robustness.
    t = jnp.concatenate([x0, pre_relu1, r1], axis=-1)
    t = conv3x3(t, p["down_large_offset_conv1"], act="leaky")
    t = conv3x3(t, p["down_large_offset_conv2"], act="leaky")
    swp = dyn_agg(p["down_large_dyn_agg"], r1, t, pre_offset["relu1_1"], pre_similarity["relu1_1"])
    h = jnp.concatenate([x0, swp], axis=-1)
    h = conv3x3(h, p["down_head_large"], act="leaky")
    h = swin_forward(p["down_body_large"], h) + x0
    x1 = conv3x3(h, p["down_tail_large"], stride=2)

    # ---- down, medium (relu2_1 level) ----
    t = jnp.concatenate([x1, pre_relu2, r2], axis=-1)
    t = conv3x3(t, p["down_medium_offset_conv1"], act="leaky")
    t = conv3x3(t, p["down_medium_offset_conv2"], act="leaky")
    swp = dyn_agg(p["down_medium_dyn_agg"], r2, t, pre_offset["relu2_1"], pre_similarity["relu2_1"])
    h = jnp.concatenate([x1, swp], axis=-1)
    h = conv3x3(h, p["down_head_medium"], act="leaky")
    h = swin_forward(p["down_body_medium"], h) + x1
    x2 = conv3x3(h, p["down_tail_medium"], stride=2)

    # ---- up, small (relu3_1 level) ----
    t = jnp.concatenate([x2, pre_relu3, r3], axis=-1)
    t = conv3x3(t, p["up_small_offset_conv1"], act="leaky")
    t = conv3x3(t, p["up_small_offset_conv2"], act="leaky")
    swp = dyn_agg(p["up_small_dyn_agg"], r3, t, pre_offset["relu3_1"], pre_similarity["relu3_1"])
    h = jnp.concatenate([x2, swp], axis=-1)
    h = conv3x3(h, p["up_head_small"], act="leaky")
    h = swin_forward(p["up_body_small"], h) + x2
    x = pixel_shuffle(conv3x3(h, p["up_tail_small"], act="leaky"), 2)

    # ---- up, medium ----
    t = jnp.concatenate([x, pre_relu2, r2], axis=-1)
    t = conv3x3(t, p["up_medium_offset_conv1"], act="leaky")
    t = conv3x3(t, p["up_medium_offset_conv2"], act="leaky")
    swp = dyn_agg(p["up_medium_dyn_agg"], r2, t, pre_offset["relu2_1"], pre_similarity["relu2_1"])
    h = jnp.concatenate([x + x1, swp], axis=-1)
    h = conv3x3(h, p["up_head_medium"], act="leaky")
    h = swin_forward(p["up_body_medium"], h) + x
    x = pixel_shuffle(conv3x3(h, p["up_tail_medium"], act="leaky"), 2)

    # ---- up, large ----
    t = jnp.concatenate([x, pre_relu1, r1], axis=-1)
    t = conv3x3(t, p["up_large_offset_conv1"], act="leaky")
    t = conv3x3(t, p["up_large_offset_conv2"], act="leaky")
    swp = dyn_agg(p["up_large_dyn_agg"], r1, t, pre_offset["relu1_1"], pre_similarity["relu1_1"])
    h = jnp.concatenate([x + x0, swp], axis=-1)
    h = conv3x3(h, p["up_head_large"], act="leaky")
    h = swin_forward(p["up_body_large"], h) + x
    x = conv3x3(h, p["up_tail_large_1"], act="leaky")
    x = conv3x3(x, p["up_tail_large_2"])
    return x


# ----------------------------------------------------------------------------
# Main
# ----------------------------------------------------------------------------
if __name__ == "__main__":
    # Small, module-consistent configuration: ngf=32, deformable groups=4,
    # depths=(2,), num_heads=(2,), window_size=4, base resolution 16x16.
    H = W = 16
    B = 1
    ngf = 32
    groups = 4
    depths = (2,)
    num_heads = (2,)
    window_size = 4

    gen = ParamGen(0)
    params = build_params(gen, ngf, groups, depths, num_heads, window_size, 2.0, H, W)

    key = jax.random.PRNGKey(0)
    ks = jax.random.split(key, 13)
    base = jax.random.normal(ks[0], (B, H, W, 3), jnp.float32)
    img_ref_feat = {
        "relu1_1": jax.random.normal(ks[1], (B, H, W, 64), jnp.float32),
        "relu2_1": jax.random.normal(ks[2], (B, H // 2, W // 2, 128), jnp.float32),
        "relu3_1": jax.random.normal(ks[3], (B, H // 4, W // 4, 256), jnp.float32),
    }
    pre_flow = {
        "relu1_1": jax.random.normal(ks[4], (B, H, W, 2), jnp.float32),
        "relu2_1": jax.random.normal(ks[5], (B, H // 2, W // 2, 2), jnp.float32),
        "relu3_1": jax.random.normal(ks[6], (B, H // 4, W // 4, 2), jnp.float32),
    }
    pre_offset = {
        "relu1_1": jax.random.normal(ks[7], (B, 9, H, W, 2), jnp.float32),
        "relu2_1": jax.random.normal(ks[8], (B, 9, H // 2, W // 2, 2), jnp.float32),
        "relu3_1": jax.random.normal(ks[9], (B, 9, H // 4, W // 4, 2), jnp.float32),
    }
    pre_similarity = {
        "relu1_1": jax.nn.sigmoid(jax.random.normal(ks[10], (B, H, W, 1), jnp.float32)),
        "relu2_1": jax.nn.sigmoid(jax.random.normal(ks[11], (B, H // 2, W // 2, 1), jnp.float32)),
        "relu3_1": jax.nn.sigmoid(jax.random.normal(ks[12], (B, H // 4, W // 4, 1), jnp.float32)),
    }

    out = forward(params, base, [pre_offset, pre_flow, pre_similarity], img_ref_feat)
    out = jax.block_until_ready(out)
    assert out.shape == (B, H, W, 3), out.shape
    assert bool(jnp.all(jnp.isfinite(out)))
    print("KERNEL_OK")
</pallas_src>

<mosaic_0001>
module attributes {stable_mosaic.version = 11 : i64} {
  func.func @_conv3_kernel(%arg0: i32, %arg1: i32, %arg2: memref<1x18x16x9xbf16, #tpu.memory_space<vmem>>, %arg3: memref<3x9x128xbf16, #tpu.memory_space<vmem>>, %arg4: memref<1x128xf32, #tpu.memory_space<vmem>>, %arg5: memref<1x8x16x128xf32, #tpu.memory_space<vmem>>) attributes {dimension_semantics = [#tpu.dimension_semantics<parallel>, #tpu.dimension_semantics<parallel>], iteration_bounds = array<i64: 1, 2>, scalar_prefetch = 0 : i64, scratch_operands = 0 : i64, tpu.core_type = #tpu.core_type<tc>, window_params = [{transform_indices = @transform_0, window_bounds = array<i64: 1, 18, 16, 9>}, {pipeline_mode = #tpu.pipeline_mode<synchronous>, transform_indices = @transform_1, window_bounds = array<i64: 3, 9, 128>}, {pipeline_mode = #tpu.pipeline_mode<synchronous>, transform_indices = @transform_2, window_bounds = array<i64: 1, 128>}, {transform_indices = @transform_3, window_bounds = array<i64: 1, 8, 16, 128>}]} {
    %c8_i32 = arith.constant 8 : i32
    %0 = arith.muli %arg1, %c8_i32 : i32
    %1 = tpu.assume_multiple %0, 8 : i32
    %cst = arith.constant 0.000000e+00 : f32
    %2 = vector.broadcast %cst : f32 to vector<128x128xf32>
    %c0_i32 = arith.constant 0 : i32
    %3 = arith.addi %1, %c0_i32 : i32
    %c0 = arith.constant 0 : index
    %4 = arith.index_cast %3 : i32 to index
    %c0_0 = arith.constant 0 : index
    %c0_1 = arith.constant 0 : index
    %5 = vector.load %arg2[%c0, %4, %c0_0, %c0_1] : memref<1x18x16x9xbf16, #tpu.memory_space<vmem>>, vector<1x8x16x9xbf16>
    %6 = vector.shape_cast %5 : vector<1x8x16x9xbf16> to vector<8x16x9xbf16>
    %7 = vector.shape_cast %6 : vector<8x16x9xbf16> to vector<128x9xbf16>
    %c0_2 = arith.constant 0 : index
    %c0_3 = arith.constant 0 : index
    %c0_4 = arith.constant 0 : index
    %8 = vector.load %arg3[%c0_2, %c0_3, %c0_4] : memref<3x9x128xbf16, #tpu.memory_space<vmem>>, vector<1x9x128xbf16>
    %9 = vector.shape_cast %8 : vector<1x9x128xbf16> to vector<9x128xbf16>
    %cst_5 = arith.constant dense<0.000000e+00> : vector<128x128xf32>
    %10 = tpu.matmul %7, %9, %cst_5 {dimension_numbers = #tpu.dot_dimension_numbers<[1], [0], [0], [1], [0, 0, 1, 1], [], []>} : vector<128x9xbf16>, vector<9x128xbf16>, vector<128x128xf32> -> vector<128x128xf32>
    %11 = arith.addf %2, %10 : vector<128x128xf32>
    %c1_i32 = arith.constant 1 : i32
    %12 = arith.addi %1, %c1_i32 : i32
    %c0_6 = arith.constant 0 : index
    %13 = arith.index_cast %12 : i32 to index
    %c0_7 = arith.constant 0 : index
    %c0_8 = arith.constant 0 : index
    %14 = vector.load %arg2[%c0_6, %13, %c0_7, %c0_8] : memref<1x18x16x9xbf16, #tpu.memory_space<vmem>>, vector<1x8x16x9xbf16>
    %15 = vector.shape_cast %14 : vector<1x8x16x9xbf16> to vector<8x16x9xbf16>
    %16 = vector.shape_cast %15 : vector<8x16x9xbf16> to vector<128x9xbf16>
    %c1 = arith.constant 1 : index
    %c0_9 = arith.constant 0 : index
    %c0_10 = arith.constant 0 : index
    %17 = vector.load %arg3[%c1, %c0_9, %c0_10] : memref<3x9x128xbf16, #tpu.memory_space<vmem>>, vector<1x9x128xbf16>
    %18 = vector.shape_cast %17 : vector<1x9x128xbf16> to vector<9x128xbf16>
    %cst_11 = arith.constant dense<0.000000e+00> : vector<128x128xf32>
    %19 = tpu.matmul %16, %18, %cst_11 {dimension_numbers = #tpu.dot_dimension_numbers<[1], [0], [0], [1], [0, 0, 1, 1], [], []>} : vector<128x9xbf16>, vector<9x128xbf16>, vector<128x128xf32> -> vector<128x128xf32>
    %20 = arith.addf %11, %19 : vector<128x128xf32>
    %c2_i32 = arith.constant 2 : i32
    %21 = arith.addi %1, %c2_i32 : i32
    %c0_12 = arith.constant 0 : index
    %22 = arith.index_cast %21 : i32 to index
    %c0_13 = arith.constant 0 : index
    %c0_14 = arith.constant 0 : index
    %23 = vector.load %arg2[%c0_12, %22, %c0_13, %c0_14] : memref<1x18x16x9xbf16, #tpu.memory_space<vmem>>, vector<1x8x16x9xbf16>
    %24 = vector.shape_cast %23 : vector<1x8x16x9xbf16> to vector<8x16x9xbf16>
    %25 = vector.shape_cast %24 : vector<8x16x9xbf16> to vector<128x9xbf16>
    %c2 = arith.constant 2 : index
    %c0_15 = arith.constant 0 : index
    %c0_16 = arith.constant 0 : index
    %26 = vector.load %arg3[%c2, %c0_15, %c0_16] : memref<3x9x128xbf16, #tpu.memory_space<vmem>>, vector<1x9x128xbf16>
    %27 = vector.shape_cast %26 : vector<1x9x128xbf16> to vector<9x128xbf16>
    %cst_17 = arith.constant dense<0.000000e+00> : vector<128x128xf32>
    %28 = tpu.matmul %25, %27, %cst_17 {dimension_numbers = #tpu.dot_dimension_numbers<[1], [0], [0], [1], [0, 0, 1, 1], [], []>} : vector<128x9xbf16>, vector<9x128xbf16>, vector<128x128xf32> -> vector<128x128xf32>
    %29 = arith.addf %20, %28 : vector<128x128xf32>
    %c0_18 = arith.constant 0 : index
    %c0_19 = arith.constant 0 : index
    %30 = vector.load %arg4[%c0_18, %c0_19] : memref<1x128xf32, #tpu.memory_space<vmem>>, vector<1x128xf32>
    %31 = vector.broadcast %30 : vector<1x128xf32> to vector<128x128xf32>
    %32 = arith.addf %29, %31 : vector<128x128xf32>
    %33 = vector.shape_cast %32 : vector<128x128xf32> to vector<8x16x128xf32>
    %c0_20 = arith.constant 0 : index
    %c0_21 = arith.constant 0 : index
    %c0_22 = arith.constant 0 : index
    %c0_23 = arith.constant 0 : index
    %34 = vector.load %arg5[%c0_20, %c0_21, %c0_22, %c0_23] : memref<1x8x16x128xf32, #tpu.memory_space<vmem>>, vector<1x8x16x128xf32>
    %35 = vector.shape_cast %34 : vector<1x8x16x128xf32> to vector<8x16x128xf32>
    %36 = vector.shape_cast %33 : vector<8x16x128xf32> to vector<1x8x16x128xf32>
    tpu.vector_store %arg5[%c0_20, %c0_21, %c0_22, %c0_23], %36 {strides = array<i32>} : memref<1x8x16x128xf32, #tpu.memory_space<vmem>>, vector<1x8x16x128xf32>,
    return
  }
  func.func @transform_0(%arg0: i32, %arg1: i32) -> (i32, i32, i32, i32) {
    %c0_i32 = arith.constant 0 : i32
    %c0_i32_0 = arith.constant 0 : i32
    %c0_i32_1 = arith.constant 0 : i32
    %c0_i32_2 = arith.constant 0 : i32
    return %arg0, %c0_i32, %c0_i32_0, %c0_i32_1 : i32, i32, i32, i32
  }
  func.func @transform_1(%arg0: i32, %arg1: i32) -> (i32, i32, i32) {
    %c0_i32 = arith.constant 0 : i32
    %c0_i32_0 = arith.constant 0 : i32
    %c0_i32_1 = arith.constant 0 : i32
    %c0_i32_2 = arith.constant 0 : i32
    return %c0_i32, %c0_i32_0, %c0_i32_1 : i32, i32, i32
  }
  func.func @transform_2(%arg0: i32, %arg1: i32) -> (i32, i32) {
    %c0_i32 = arith.constant 0 : i32
    %c0_i32_0 = arith.constant 0 : i32
    %c0_i32_1 = arith.constant 0 : i32
    return %c0_i32, %c0_i32_0 : i32, i32
  }
  func.func @transform_3(%arg0: i32, %arg1: i32) -> (i32, i32, i32, i32) {
    %c0_i32 = arith.constant 0 : i32
    %c0_i32_0 = arith.constant 0 : i32
    %c0_i32_1 = arith.constant 0 : i32
    return %arg0, %arg1, %c0_i32, %c0_i32_0 : i32, i32, i32, i32
  }
}

</mosaic_0001>

<bundles_post_ra>
// kernel: tpu_custom_call.1
= control target key start
LH: loop header
LB: loop body
LE: loop exit
PB: predicated region body
PF: predicated region fallthrough
CT: control target
= control target key end

     0   :  { %8 = vsyncpa [#allocation3], 0  ;;  %s1546_s0 = inlined_call_operand.vmem [shape: bf16[1,18,16,9], index: 0, kind: input, shape index: {}]   ;;  %s1547_s1 = inlined_call_operand.vmem [shape: bf16[3,9,128], index: 1, kind: input, shape index: {}]   ;;  %s1548_s2 = inlined_call_operand.vmem [shape: f32[1,128], index: 2, kind: input, shape index: {}]   ;;  %s1549_s3 = inlined_call_operand.hbm [shape: f32[1,16,16,128], index: 3, kind: output, shape index: {}]  }
   0x1   :  { %10 = vsyncpa [#allocation3 + $0x1], 0  ;;  %s1306_s12 = smov 0   ;;  %s1308_s13 = smov 0  }
   0x2   :  { %s1310_s14 = smov 0   ;;  %s1312_s15 = smov 0  }
   0x3   :  { %s1314_s16 = smov 0   ;;  %s1316_s17 = smov 0  }
   0x4 LB: > { %s923_s18 = sadd.s32 4294967295, %s1280_s17   ;;  %s924_s19 = sadd.s32 4294967294, %s1280_s17   ;;  %s1280_s17 = sphi %s1316_s17, %s16_s17   ;;  %s1276_s16 = sphi %s1314_s16, %s1556_s16   ;;  %s1272_s15 = sphi %s1312_s15, %s1555_s15   ;;  %s1268_s14 = sphi %s1310_s14, %s1554_s14   ;;  %s1264_s13 = sphi %s1308_s13, %s1553_s13   ;;  %s1260_s12 = sphi %s1306_s12, %s1552_s12  }
   0x5   : > { %s25_s20 = sadd.s32 1, %s1276_s16  ;;  %s105_s21 = sadd.s32 1, %s1268_s14 }
   0x6   : > { %p26_p0 = scmp.ge.s32.totalorder %s25_s20, 2  ;;  %p115_p1 = scmp.ne.s32.totalorder %s1268_s14, %s1264_s13 }
   0x7   : > { %p116_p2 = scmp.eq.s32.totalorder %s923_s18, 1  ;;  %p121_p3 = scmp.ne.s32.totalorder %s1264_s13, %s1260_s12 }
   0x8   : > { %s1558_s20 = smov (%p26_p0, %s25_s20), 0  ;;  %p122_p5 = scmp.eq.s32.totalorder %s924_s19, 1 }
   0x9   : > { %p1346_p4 = por %p116_p2, %p115_p1  ;;  %s101_s23 = ssub.s32 %s1276_s16, %s1558_s20 }
   0xa   : > { %p927_p6 = scmp.ge.s32.totalorder %s1280_s17, 1  ;;  %p103_p7 = scmp.eq.s32.totalorder %s101_s23, 0 }
   0xb   : > { %p1353_p8 = por %p122_p5, %p121_p3  ;;  %p154_p9 = scmp.lt.s32.totalorder %s1280_s17, 3 }
   0xc   : > { %s1359_s25 = scalar_select %p103_p7, %s1268_s14, %s105_s21  }
   0xd   : > { %p155_p10 = pnand %p927_p6, %p154_p9 }
   0xe   : > { %s1031_s28 = sshll.u32 (!%p155_p10), %s1272_s15, 6  ;;  %s175_s9 = sand.u32 (!%p155_p10), 1, %s1264_s13  }
   0xf   : > { %158 = sbr.rel (%p155_p10) target bundleno = 288 (0x120), region = 32  ;;  %s1368_s4 = scalar_lea.vmem (!%p155_p10), %s1546_s0, %s1031_s28 }
  0x10   : > { %s928_s10 = sshll.u32 (!%p155_p10), %s175_s9, 7  ;;  %s1035_s21 = sshll.u32 (!%p155_p10), %s1272_s15, 11 }
  0x11   : > { %s1449_s19 = scalar_lea.vmem (!%p155_p10), [#allocation2], %s928_s10  ;;  %s1492_s28 = scalar_lea.hbm (!%p155_p10), %s1549_s3, %s1035_s21 }
  0x12   : > { %s837_s23 = sshll.u32 (!%p155_p10), %s1449_s19, 4  ;;  %s1501_s15 = scalar_lea.sflag (!%p155_p10), [#allocation3], %s175_s9  ;;  %s1494_s23 = int_to_ptr.vmem [resolvable:$true] %s837_s23 }
  0x13   : > { %s1204_s29 = scalar_lea.vmem (!%p155_p10), %s1494_s23, 2048  ;;  %s1283_s30 = smov (!%p155_p10), [#allocation2]  }
  0x14   : > { %v1177_v0 = vld [vmem:[%s1547_s1 + $0x8] sm:$0x1f]   ;;  %vm300_vm0 = vcmask 1043456   ;;  %vm301_vm1 = vcmask 1044480   ;;  %v1282_v1 = vmov 65535   ;;  %vm275_vm2 = vcmask 72704   ;;  %p1205_p11 = scmp.ne.s32.totalorder %s1494_s23, %s1204_s29 }
  0x15   : > { %v302_v2 = vsel %vm300_vm0, 4294967295, %v1282_v1  ;;  %v1178_v4 = vld [vmem:[%s1368_s4 + $0x8] sm:$0xff]   ;;  %v1180_v7 = vld [vmem:[%s1368_s4 + $0x10] sm:$0xff]   ;;  %v1182_v9 = vld [vmem:[%s1547_s1] sm:$0x1f]  }
  0x16   : > { %v303_v3 = vsel %vm301_vm1, %v302_v2, 0  ;;  %v1179_v6 = vld [vmem:[%s1368_s4 + $0x28] sm:$0xff]   ;;  %1065 = vmatprep.mubr.msk.bf16.mxu0 %vm275_vm2, %v1178_v4  ;;  %v1181_v8 = vld [vmem:[%s1368_s4 + $0x30] sm:$0xff]   ;;  %v1184_v12 = vld [vmem:[%s1368_s4 + $0x18] sm:$0xff]   ;;  %p1206_p12 = pnand %p1205_p11, %p1346_p4 }
  0x17   : > { %v305_v5 = vand.u32 %v1177_v0, %v303_v3  ;;  %1073 = vmatprep.mubr.msk.bf16.mxu1 %vm275_vm2, %v1179_v6  ;;  %v1183_v10 = vld [vmem:[%s1547_s1 + $0x10] sm:$0x1f]   ;;  %v474_v11 = vand.u32 %v1182_v9, %v303_v3  ;;  %v1185_v14 = vld [vmem:[%s1368_s4 + $0x38] sm:$0xff]   ;;  %v1186_v15 = vld [vmem:[%s1368_s4 + $0x20] sm:$0xff]  }
  0x18   : > { %v666_v13 = vand.u32 %v1183_v10, %v303_v3  ;;  %v1187_v16 = vld [vmem:[%s1368_s4 + $0x40] sm:$0xff]   ;;  %v1189_v18 = vld [vmem:[%s1368_s4 + $0x10] sm:$0xff]   ;;  %v1190_v19 = vld [vmem:[%s1368_s4 + $0x8] sm:$0xff]   ;;  %p1207_p13 = pneg %p1206_p12 }
  0x19   : > { %1063 = vmatprep.subr.bf16.mxu0 %v305_v5  ;;  %1117 = vmatprep.subr.bf16.mxu1 %v305_v5  ;;  %v1188_v17 = vld [vmem:[%s1368_s4] sm:$0xff]   ;;  %v1191_v20 = vld [vmem:[%s1368_s4 + $0x18] sm:$0xff]   ;;  %v1192_v21 = vld [vmem:[%s1368_s4 + $0x10] sm:$0xff]  }
  0x1a   : > { %1064 = vmatpush3.bf16.msra.mxu0 %v305_v5  ;;  %1118 = vmatpush3.bf16.msra.mxu1 %v305_v5  ;;  %v1193_v22 = vld [vmem:[%s1368_s4 + $0x20] sm:$0xff]   ;;  %v1194_v23 = vld [vmem:[%s1368_s4 + $0x18] sm:$0xff]   ;;  %v1195_v24 = vld [vmem:[%s1368_s4 + $0x28] sm:$0xff]  }
  0x1b   : > { %1081 = vmatprep.subr.bf16.mxu1 %v474_v11  ;;  %1099 = vmatprep.subr.bf16.mxu0 %v666_v13  ;;  %v1196_v25 = vld [vmem:[%s1368_s4 + $0x20] sm:$0xff]   ;;  %v1197_v26 = vld [vmem:[%s1368_s4 + $0x30] sm:$0xff]   ;;  %v1198_v27 = vld [vmem:[%s1368_s4 + $0x28] sm:$0xff]  }
  0x1c   : > { %v1199_v28 = vld [vmem:[%s1368_s4 + $0x38] sm:$0xff]   ;;  %v1200_v29 = vld [vmem:[%s1368_s4 + $0x30] sm:$0xff]   ;;  %v1201_v30 = vld [vmem:[%s1368_s4 + $0x40] sm:$0xff]  }
  0x1d   : > { %1066 = vmatmul.mubr.msk.bf16.vlgmr.msra.gmra.mxu0 %vm275_vm2, %v1180_v7  ;;  %1074 = vmatmul.mubr.msk.bf16.vlgmr.msra.gmra.mxu1 %vm275_vm2, %v1181_v8  ;;  %v1202_v31 = vld [vmem:[%s1368_s4 + $0x38] sm:$0xff]   ;;  %v1203_v32 = vld [vmem:[%s1368_s4 + $0x48] sm:$0xff]   ;;  %v1446_v52 = vld [vmem:[%s1548_s2] ss:$0 sm:$0xff]  ;;  %s1208_s4 = sshll.u32 %s1283_s30, 4  ;;  %s1209_s4 = int_to_ptr.vmem [resolvable:$false] %s1208_s4 }
  0x1e   : > { %1069 = vmatprep.mubr.msk.bf16.mxu0 %vm275_vm2, %v1184_v12  ;;  %1082 = vmatpush3.bf16.msra.mxu1 %v474_v11  ;;  %s1210_s5 = scalar_lea.vmem %s1209_s4, 4096  ;;  %p1211_p0 = scmp.lt.s32.totalorder %s1494_s23, %s1209_s4 }
  0x1f   : > { %1100 = vmatpush3.bf16.msra.mxu0 %v666_v13  ;;  %1077 = vmatprep.mubr.msk.bf16.mxu1 %vm275_vm2, %v1185_v14  ;;  %p1212_p1 = scmp.lt.s32.totalorder %s1210_s5, %s1204_s29 }
  0x21   : > { %p1213_p2 = por %p1212_p1, %p1211_p0 }
  0x23   : > { %p1214_p3 = pnand %p1213_p2, %p1207_p13 }
  0x25   : > { %1070 = vmatmul.mubr.msk.bf16.gmra.mxu0 %vm275_vm2, %v1186_v15  ;;  %1078 = vmatmul.mubr.msk.bf16.gmra.mxu1 %vm275_vm2, %v1187_v16 }
  0x26   : > { %1083 = vmatprep.mubr.msk.bf16.mxu1 %vm275_vm2, %v1188_v17  ;;  %1101 = vmatprep.mubr.msk.bf16.mxu0 %vm275_vm2, %v1189_v18 }
  0x2d   : > { %1084 = vmatmul.mubr.msk.bf16.vlgmr.msra.gmra.mxu1 %vm275_vm2, %v1190_v19  ;;  %1102 = vmatmul.mubr.msk.bf16.vlgmr.msra.gmra.mxu0 %vm275_vm2, %v1191_v20 }
  0x2e   : > { %1087 = vmatprep.mubr.msk.bf16.mxu1 %vm275_vm2, %v1192_v21  ;;  %1105 = vmatprep.mubr.msk.bf16.mxu0 %vm275_vm2, %v1193_v22 }
  0x35   : > { %1088 = vmatmul.mubr.msk.bf16.gmra.mxu1 %vm275_vm2, %v1194_v23  ;;  %1106 = vmatmul.mubr.msk.bf16.gmra.mxu0 %vm275_vm2, %v1195_v24 }
  0x36   : > { %1091 = vmatprep.mubr.msk.bf16.mxu1 %vm275_vm2, %v1196_v25  ;;  %1109 = vmatprep.mubr.msk.bf16.mxu0 %vm275_vm2, %v1197_v26 }
  0x3d   : > { %1092 = vmatmul.mubr.msk.bf16.gmra.mxu1 %vm275_vm2, %v1198_v27  ;;  %1110 = vmatmul.mubr.msk.bf16.gmra.mxu0 %vm275_vm2, %v1199_v28 }
  0x3e   : > { %1095 = vmatprep.mubr.msk.bf16.mxu1 %vm275_vm2, %v1200_v29  ;;  %1113 = vmatprep.mubr.msk.bf16.mxu0 %vm275_vm2, %v1201_v30 }
  0x45   : > { %1096 = vmatmul.mubr.msk.bf16.gmra.mxu1 %vm275_vm2, %v1202_v31  ;;  %1114 = vmatmul.mubr.msk.bf16.gmra.mxu0 %vm275_vm2, %v1203_v32 }
  0xdd   : > { %v1067_v33 = vpop.f32.mrf.mxu0  ;;  %v1424_v34 = vpop.f32.mrf.mxu1 }
  0xdf   : > { %v341_v35 = vpop.f32.mrf.mxu0  ;;  %v1426_v36 = vpop.f32.mrf.mxu1 }
  0xe1   : > { %v1068_v37 = vpop.f32.mrf.mxu0  ;;  %v1428_v38 = vpop.f32.mrf.mxu1 }
  0xe3   : > { %v344_v39 = vpop.f32.mrf.mxu0  ;;  %v1430_v40 = vpop.f32.mrf.mxu1 }
  0xe5   : > { %v1071_v41 = vpop.f32.mrf.mxu0  ;;  %v1432_v42 = vpop.f32.mrf.mxu1 }
  0xe7   : > { %v357_v43 = vpop.f32.mrf.mxu0  ;;  %v1434_v44 = vpop.f32.mrf.mxu1 }
  0xe9   : > { %v1072_v45 = vpop.f32.mrf.mxu0  ;;  %v1436_v46 = vpop.f32.mrf.mxu1 }
  0xeb   : > { %v360_v47 = vpop.f32.mrf.mxu0  ;;  %v1438_v48 = vpop.f32.mrf.mxu1 }
  0xed   : > { %v1085_v49 = vpop.f32.mrf.mxu1  ;;  %v1103_v50 = vpop.f32.mrf.mxu0 }
  0xee   : > { %v519_v51 = vadd.f32 %v1085_v49, %v1067_v33 }
  0xef   : > { %v510_v53 = vpop.f32.mrf.mxu1  ;;  %v702_v54 = vpop.f32.mrf.mxu0 }
  0xf0   : > { %v767_v55 = vadd.f32 %v1103_v50, %v519_v51  ;;  %v511_v56 = vadd.f32 %v510_v53, %v341_v35 }
  0xf1   : > { %v1086_v57 = vpop.f32.mrf.mxu1  ;;  %v1104_v58 = vpop.f32.mrf.mxu0 }
  0xf2   : > { %v790_v59 = vadd.f32 %v1446_v52, %v767_v55  ;;  %v765_v60 = vadd.f32 %v702_v54, %v511_v56  ;;  %v522_v61 = vadd.f32 %v1086_v57, %v1068_v37 }
  0xf3   : > { %v513_v62 = vpop.f32.mrf.mxu1  ;;  %v705_v63 = vpop.f32.mrf.mxu0 }
  0xf4   : > { %806 = vst [vmem:[%s1449_s19 + $0x10] sm:$0xff] %v790_v59  ;;  %v788_v0 = vadd.f32 %v1446_v52, %v765_v60  ;;  %v768_v1 = vadd.f32 %v1104_v58, %v522_v61  ;;  %v514_v2 = vadd.f32 %v513_v62, %v344_v39 }
  0xf5   : > { %v1089_v3 = vpop.f32.mrf.mxu1  ;;  %v1107_v4 = vpop.f32.mrf.mxu0 }
  0xf6   : > { %804 = vst [vmem:[%s1449_s19] sm:$0xff] %v788_v0  ;;  %v791_v5 = vadd.f32 %v1446_v52, %v768_v1  ;;  %v766_v6 = vadd.f32 %v705_v63, %v514_v2  ;;  %v535_v7 = vadd.f32 %v1089_v3, %v1071_v41 }
  0xf7   : > { %v526_v8 = vpop.f32.mrf.mxu1  ;;  %v718_v9 = vpop.f32.mrf.mxu0 }
  0xf8   : > { %807 = vst [vmem:[%s1449_s19 + $0x18] sm:$0xff] %v791_v5  ;;  %v789_v10 = vadd.f32 %v1446_v52, %v766_v6  ;;  %v771_v11 = vadd.f32 %v1107_v4, %v535_v7  ;;  %v527_v12 = vadd.f32 %v526_v8, %v357_v43 }
  0xf9   : > { %v1090_v13 = vpop.f32.mrf.mxu1  ;;  %v1108_v14 = vpop.f32.mrf.mxu0 }
  0xfa   : > { %805 = vst [vmem:[%s1449_s19 + $0x8] sm:$0xff] %v789_v10  ;;  %v794_v15 = vadd.f32 %v1446_v52, %v771_v11  ;;  %v769_v16 = vadd.f32 %v718_v9, %v527_v12  ;;  %v538_v17 = vadd.f32 %v1090_v13, %v1072_v45 }
  0xfb   : > { %v529_v18 = vpop.f32.mrf.mxu1  ;;  %v721_v19 = vpop.f32.mrf.mxu0 }
  0xfc   : > { %810 = vst [vmem:[%s1449_s19 + $0x30] sm:$0xff] %v794_v15  ;;  %v792_v20 = vadd.f32 %v1446_v52, %v769_v16  ;;  %v772_v21 = vadd.f32 %v1108_v14, %v538_v17  ;;  %v530_v22 = vadd.f32 %v529_v18, %v360_v47 }
  0xfd   : > { %v1093_v23 = vpop.f32.mrf.mxu1  ;;  %v1111_v24 = vpop.f32.mrf.mxu0 }
  0xfe   : > { %808 = vst [vmem:[%s1449_s19 + $0x20] sm:$0xff] %v792_v20  ;;  %v795_v25 = vadd.f32 %v1446_v52, %v772_v21  ;;  %v770_v26 = vadd.f32 %v721_v19, %v530_v22  ;;  %v551_v27 = vadd.f32 %v1093_v23, %v1424_v34 }
  0xff   : > { %v542_v28 = vpop.f32.mrf.mxu1  ;;  %v734_v29 = vpop.f32.mrf.mxu0 }
 0x100   : > { %811 = vst [vmem:[%s1449_s19 + $0x38] sm:$0xff] %v795_v25  ;;  %v793_v30 = vadd.f32 %v1446_v52, %v770_v26  ;;  %v775_v31 = vadd.f32 %v1111_v24, %v551_v27  ;;  %v543_v32 = vadd.f32 %v542_v28, %v1426_v36 }
 0x101   : > { %v1094_v33 = vpop.f32.mrf.mxu1  ;;  %v1112_v35 = vpop.f32.mrf.mxu0 }
 0x102   : > { %809 = vst [vmem:[%s1449_s19 + $0x28] sm:$0xff] %v793_v30  ;;  %v798_v37 = vadd.f32 %v1446_v52, %v775_v31  ;;  %v773_v39 = vadd.f32 %v734_v29, %v543_v32  ;;  %v554_v41 = vadd.f32 %v1094_v33, %v1428_v38 }
 0x103   : > { %v545_v43 = vpop.f32.mrf.mxu1  ;;  %v737_v34 = vpop.f32.mrf.mxu0 }
 0x104   : > { %814 = vst [vmem:[%s1449_s19 + $0x50] sm:$0xff] %v798_v37  ;;  %v796_v45 = vadd.f32 %v1446_v52, %v773_v39  ;;  %v776_v47 = vadd.f32 %v1112_v35, %v554_v41  ;;  %v546_v49 = vadd.f32 %v545_v43, %v1430_v40 }
 0x105   : > { %v1097_v50 = vpop.f32.mrf.mxu1  ;;  %v1115_v36 = vpop.f32.mrf.mxu0 }
 0x106   : > { %812 = vst [vmem:[%s1449_s19 + $0x40] sm:$0xff] %v796_v45  ;;  %v799_v51 = vadd.f32 %v1446_v52, %v776_v47  ;;  %v774_v53 = vadd.f32 %v737_v34, %v546_v49  ;;  %v567_v54 = vadd.f32 %v1097_v50, %v1432_v42 }
 0x107   : > { %v558_v55 = vpop.f32.mrf.mxu1  ;;  %v750_v38 = vpop.f32.mrf.mxu0 }
 0x108   : > { %815 = vst [vmem:[%s1449_s19 + $0x58] sm:$0xff] %v799_v51  ;;  %v797_v56 = vadd.f32 %v1446_v52, %v774_v53  ;;  %v779_v57 = vadd.f32 %v1115_v36, %v567_v54  ;;  %v559_v40 = vadd.f32 %v558_v55, %v1434_v44 }
 0x109   : > { %v1098_v58 = vpop.f32.mrf.mxu1  ;;  %v1116_v59 = vpop.f32.mrf.mxu0 }
 0x10a   : > { %813 = vst [vmem:[%s1449_s19 + $0x48] sm:$0xff] %v797_v56  ;;  %v802_v60 = vadd.f32 %v1446_v52, %v779_v57  ;;  %v777_v61 = vadd.f32 %v750_v38, %v559_v40  ;;  %v570_v42 = vadd.f32 %v1098_v58, %v1436_v46 }
 0x10b   : > { %v561_v62 = vpop.f32.mrf.mxu1  ;;  %v753_v44 = vpop.f32.mrf.mxu0 }
 0x10c   : > { %818 = vst [vmem:[%s1449_s19 + $0x70] sm:$0xff] %v802_v60  ;;  %v800_v63 = vadd.f32 %v1446_v52, %v777_v61  ;;  %v780_v0 = vadd.f32 %v1116_v59, %v570_v42  ;;  %v562_v1 = vadd.f32 %v561_v62, %v1438_v48 }
 0x10e   : > { %816 = vst [vmem:[%s1449_s19 + $0x60] sm:$0xff] %v800_v63  ;;  %v803_v2 = vadd.f32 %v1446_v52, %v780_v0  ;;  %v778_v3 = vadd.f32 %v753_v44, %v562_v1 }
 0x110   : > { %819 = vst [vmem:[%s1449_s19 + $0x78] sm:$0xff] %v803_v2  ;;  %v801_v46 = vadd.f32 %v1446_v52, %v778_v3 }
 0x112   : > { %817 = vst [vmem:[%s1449_s19 + $0x68] sm:$0xff] %v801_v46 }
 0x113   : > { %1217 = shalt.err (!%p1214_p3)
}
 0x114   : > { %s1218_s6 = scalar_lea.hbm %s1492_s28, 2048  ;;  %s1222_s9 = scalar_lea.hbm %s1549_s3, 4096 }
 0x115   : > { %p1219_p5 = scmp.ne.s32.totalorder %s1492_s28, %s1218_s6  ;;  %p1223_p9 = scmp.lt.s32.totalorder %s1492_s28, %s1549_s3 }
 0x116   : > { %p1224_p10 = scmp.lt.s32.totalorder %s1222_s9, %s1218_s6 }
 0x117   : > { %p1220_p6 = pnand %p1219_p5, %p1346_p4 }
 0x118   : > { %p1225_p11 = por %p1224_p10, %p1223_p9 }
 0x119   : > { %p1221_p7 = pneg %p1220_p6 }
 0x11b   : > { %p1226_p12 = pnand %p1225_p11, %p1221_p7 }
 0x11d   : > { %1229 = shalt.err (!%p1226_p12)
}
 0x11e   : > { %s1284_s18 = smov 128   ;;  %s1285_s19 = smov 8  }
 0x11f   : > { %1119 = dma.vmem_to_hbm [thread:$0]  (%p1346_p4), %s1494_s23, 2048, %s1492_s28, %s1501_s15, %s1284_s18, %s1284_s18, %s1285_s19  }
 0x120 PF: > { %p1125_p13 = scmp.ge.s32.totalorder %s1280_s17, 2  ;;  %s852_s21 = sand.u32 1, %s1260_s12  }
 0x121   : > { %s853_s26 = scalar_lea.sflag [#allocation3], %s852_s21 }
 0x122   : > { %p1122_p0 = pnand %p1125_p13, %p1353_p8 }
 0x124   : > { %p1123_p1 = pneg %p1122_p0 }
 0x126   : > { %1255 = dma.done.wait (%p1123_p1), %s853_s26, 2048  }
 0x127   : > { %1257 = vsyncadd (%p1123_p1), %s853_s26, 4294965248  ;;  %s16_s17 = sadd.s32 1, %s1280_s17   ;;  %s1552_s12 = smov %s1264_s13 }
 0x128   : > { %p13_p2 = scmp.ge.s32.totalorder %s16_s17, 4   ;;  %s1553_s13 = smov %s1268_s14 }
 0x129   : > { %s1554_s14 = smov %s1359_s25  ;;  %s1555_s15 = smov %s1276_s16 }
 0x12a   : > { %s1556_s16 = smov %s1558_s20  ;;  %15 = sbr.rel (!%p13_p2) target bundleno = 4 (0x4), region = 72 }
 0x12f   :  { %858 = vsyncpa [#allocation3], 1 }
 0x130   :  { %860 = vsyncpa [#allocation3 + $0x1], 1 }

</bundles_post_ra>
